<compile_context>
chip_gen: v7x
topology: tpu7x:2x2x1
jax: 0.10.0
libtpu: 0.0.40
codegen_flags: <defaults>
</compile_context>

<pallas_src>
import functools
import numpy as np
import jax
import jax.numpy as jnp
from jax import lax
from jax.experimental import pallas as pl
from jax.experimental.pallas import tpu as pltpu

LOG_2PI = float(np.log(2.0 * np.pi))


def _round_up(x, m):
    return ((x + m - 1) // m) * m


def _stable_softplus(x):
    # log(1 + exp(x)) without overflow (exp argument always <= 0); avoids log1p lowering.
    return jnp.maximum(x, 0.0) + jnp.log(1.0 + jnp.exp(-jnp.abs(x)))


# ----------------------------------------------------------------------------
# forward():  V = eps * softplus(V_);  return (m, V)   (tiny op — plain JAX)
# ----------------------------------------------------------------------------
def dirniw_forward(m, v_raw, eps=0.1):
    return m, eps * jax.nn.softplus(v_raw)


# ----------------------------------------------------------------------------
# map_em(): mog_eval (E-step) + map_m_step (M-step), fused, N-chunk streamed.
# grid = (B, num_iters, num_chunks); scratch carries EM state across grid steps.
# ----------------------------------------------------------------------------
def _map_em_kernel(tau, eps, neg_half_d_log2pi, sigma_floor,
                   data_ref, mask_ref, m_ref, vraw_ref,
                   pi_ref, mu_ref, sigma_ref, qq_ref,
                   pi_s, mu_s, sigma_s, wsum_s, wxsum_s, wxxsum_s):
    it = pl.program_id(1)
    c = pl.program_id(2)
    last_c = pl.num_programs(2) - 1

    m = m_ref[...]                       # (p, d)
    p = m.shape[0]

    # mode(): initialize EM state from the prior once per batch element.
    @pl.when(jnp.logical_and(it == 0, c == 0))
    def _init():
        pi_s[...] = jnp.full((p, 1), 1.0 / p, dtype=jnp.float32)
        mu_s[...] = m
        sigma_s[...] = eps * _stable_softplus(vraw_ref[...])   # fused forward()

    # Zero the sufficient-statistic accumulators at the start of every EM iteration.
    @pl.when(c == 0)
    def _zero_acc():
        wsum_s[...] = jnp.zeros_like(wsum_s)
        wxsum_s[...] = jnp.zeros_like(wxsum_s)
        wxxsum_s[...] = jnp.zeros_like(wxxsum_s)

    # ------------------- E-step (mog_eval) on this N-chunk -------------------
    x = data_ref[0]                      # (chunk, d)  — native layout, no transpose
    msk = mask_ref[0]                    # (1, chunk)
    x2 = x * x                           # per chunk; deliberately not hoisted

    mu = mu_s[...]                       # (p, d)
    Sigma = sigma_s[...]                 # (p, d)
    inv_S = pl.reciprocal(Sigma, approx=False)
    a1 = (-0.5 * inv_S).astype(x.dtype)  # coefficient of x^2
    a2 = (mu * inv_S).astype(x.dtype)    # coefficient of x
    cc = (neg_half_d_log2pi
          - 0.5 * jnp.sum(jnp.log(Sigma) + mu * mu * inv_S, axis=-1, keepdims=True)
          + jnp.log(pi_s[...]))          # (p, 1)

    dn = (((1,), (1,)), ((), ()))        # contract the d axis of both operands
    jll = (lax.dot_general(a1, x2, dn, preferred_element_type=jnp.float32)
           + lax.dot_general(a2, x, dn, preferred_element_type=jnp.float32)
           + cc)                         # (p, chunk): lane-dense, softmax over sublanes

    mmax = jnp.max(jll, axis=0, keepdims=True)          # (1, chunk)
    pexp = jnp.exp(jll - mmax)                          # (p, chunk)
    denom = jnp.sum(pexp, axis=0, keepdims=True)        # (1, chunk)
    r0 = pl.reciprocal(denom, approx=True)              # EUP slot
    rden = r0 * (2.0 - denom * r0)                      # one Newton step (f32 accuracy)
    qq = pexp * (msk * rden)                            # responsibilities, masked
    qq_ref[0] = qq                                      # lane-dense (p, chunk) store

    # ------------------- accumulate M-step sufficient statistics -------------
    qx = qq.astype(x.dtype)
    wsum_s[...] += jnp.sum(qq, axis=-1, keepdims=True)                       # (p, 1)
    wxsum_s[...] += jnp.dot(qx, x, preferred_element_type=jnp.float32)       # (p, d)
    wxxsum_s[...] += jnp.dot(qx, x2, preferred_element_type=jnp.float32)     # (p, d)

    # ------------------- M-step (map_m_step) after the last chunk ------------
    @pl.when(c == last_c)
    def _m_step():
        V = eps * _stable_softplus(vraw_ref[...])                            # (p, d)
        wsum_reg = wsum_s[...] + tau                                         # (p, 1)
        r = pl.reciprocal(wsum_reg, approx=False)
        inv_total = pl.reciprocal(jnp.sum(wsum_reg, keepdims=True), approx=False)
        pi_new = wsum_reg * inv_total
        mu_new = (wxsum_s[...] + m * tau) * r
        sig_new = (wxxsum_s[...] + (V + m * m) * tau) * r - mu_new * mu_new
        sig_new = jnp.maximum(sig_new, sigma_floor)    # numerical guard (>=0 in exact math)
        pi_s[...] = pi_new
        mu_s[...] = mu_new
        sigma_s[...] = sig_new
        pi_ref[0] = pi_new
        mu_ref[0] = mu_new
        sigma_ref[0] = sig_new


def dirniw_map_em(data, m, v_raw, eps=0.1, mask=None, num_iters=3, tau=1.0,
                  chunk_n=512, compute_dtype=jnp.float32):
    """EM with the conjugate prior (prior=None path of DirNIWNet.map_em)."""
    if tau <= 0.0:
        raise ValueError("tau must be > 0 (keeps wsum_reg > 0 so log(pi) is finite).")
    B, N, d = data.shape
    p = m.shape[0]

    # Pad N up to a lane-friendly multiple-of-128 chunk grid; tails handled by the mask.
    chunk = min(_round_up(chunk_n, 128), _round_up(N, 128))
    n_pad = _round_up(N, chunk)
    num_chunks = n_pad // chunk

    data_p = jnp.zeros((B, n_pad, d), compute_dtype).at[:, :N, :].set(
        data.astype(compute_dtype))
    if mask is None:
        mask = jnp.ones((B, N), jnp.float32)
    mask_p = jnp.zeros((B, 1, n_pad), jnp.float32).at[:, 0, :N].set(
        mask.astype(jnp.float32))

    # Scoped-VMEM budget derived from the resident set (double-buffered blocks + scratch
    # + (p,chunk)/(chunk,d) temporaries), with headroom.  Kept <= 48 MiB for v7x.
    cbytes = np.dtype(compute_dtype).itemsize
    est = (2 * chunk * d * cbytes            # data blocks (double-buffered)
           + 2 * chunk * 4                   # mask blocks
           + 2 * p * chunk * 4               # qq output blocks
           + 4 * p * d * 4                   # m, v_raw blocks
           + 6 * p * d * 4                   # mu/Sigma outputs + scratch params/stats
           + 4 * p * chunk * 4               # jll/pexp/qq temporaries
           + chunk * d * cbytes)             # x*x temporary
    vmem_limit = int(min(max(2 * est + (8 << 20), 32 << 20), 48 << 20))

    kernel = functools.partial(_map_em_kernel, float(tau), float(eps),
                               -0.5 * float(d) * LOG_2PI, 1e-30)

    pi_o, mu_o, sigma_o, qq_o = pl.pallas_call(
        kernel,
        grid_spec=pltpu.PrefetchScalarGridSpec(
            num_scalar_prefetch=0,
            grid=(B, int(num_iters), num_chunks),
            in_specs=[
                pl.BlockSpec((1, chunk, d), lambda b, it, c: (b, c, 0)),   # data chunk
                pl.BlockSpec((1, 1, chunk), lambda b, it, c: (b, 0, c)),   # mask chunk
                pl.BlockSpec((p, d), lambda b, it, c: (0, 0)),             # m
                pl.BlockSpec((p, d), lambda b, it, c: (0, 0)),             # V_ (raw)
            ],
            out_specs=(
                pl.BlockSpec((1, p, 1), lambda b, it, c: (b, 0, 0)),       # pi
                pl.BlockSpec((1, p, d), lambda b, it, c: (b, 0, 0)),       # mu
                pl.BlockSpec((1, p, d), lambda b, it, c: (b, 0, 0)),       # Sigma
                pl.BlockSpec((1, p, chunk), lambda b, it, c: (b, 0, c)),   # qq (p, N)
            ),
            scratch_shapes=[
                pltpu.VMEM((p, 1), jnp.float32),   # pi state
                pltpu.VMEM((p, d), jnp.float32),   # mu state
                pltpu.VMEM((p, d), jnp.float32),   # Sigma state
                pltpu.VMEM((p, 1), jnp.float32),   # wsum accumulator
                pltpu.VMEM((p, d), jnp.float32),   # wxsum accumulator
                pltpu.VMEM((p, d), jnp.float32),   # wxxsum accumulator
            ],
        ),
        out_shape=(
            jax.ShapeDtypeStruct((B, p, 1), jnp.float32),
            jax.ShapeDtypeStruct((B, p, d), jnp.float32),
            jax.ShapeDtypeStruct((B, p, d), jnp.float32),
            jax.ShapeDtypeStruct((B, p, n_pad), jnp.float32),
        ),
        compiler_params=pltpu.CompilerParams(
            dimension_semantics=("parallel", "arbitrary", "arbitrary"),
            vmem_limit_bytes=vmem_limit),
    )(data_p, mask_p, m.astype(jnp.float32), v_raw.astype(jnp.float32))

    # API parity with the PyTorch module: pi (B, p), qq (B, N, p).
    pi = pi_o[:, :, 0]
    qq = jnp.swapaxes(qq_o[:, :, :N], 1, 2)
    return pi, mu_o, sigma_o, qq


# ----------------------------------------------------------------------------
# Pure-JAX references (semantics copied from the PyTorch module) for validation.
# ----------------------------------------------------------------------------
def ref_forward(m, v_raw, eps=0.1):
    return m, eps * jax.nn.softplus(v_raw)


def ref_map_em(data, m, V, num_iters=3, tau=1.0):
    B, N, d = data.shape
    p = m.shape[0]
    pi = jnp.full((B, p), 1.0 / p)
    mu = jnp.broadcast_to(m, (B, p, d))
    Sigma = jnp.broadcast_to(V, (B, p, d))
    mask = jnp.ones((B, N))
    qq = None
    for _ in range(num_iters):
        jll = -0.5 * (d * LOG_2PI
                      + jnp.log(Sigma).sum(-1)[:, None, :]
                      + jnp.einsum('bnd,bkd->bnk', data ** 2, 1.0 / Sigma)
                      + (mu ** 2 / Sigma).sum(-1)[:, None, :]
                      - 2.0 * jnp.einsum('bnd,bkd->bnk', data, mu / Sigma)
                      ) + jnp.log(pi)[:, None, :]
        mmax = jll.max(-1, keepdims=True)
        mll = mmax + jnp.log(jnp.exp(jll - mmax).sum(-1, keepdims=True))
        qq = jnp.exp(jll - mll) * mask[..., None]
        wsum = qq.sum(1)
        wsum_reg = wsum + tau
        wxsum = jnp.einsum('bnk,bnd->bkd', qq, data)
        wxxsum = jnp.einsum('bnk,bnd->bkd', qq, data ** 2)
        pi = wsum_reg / wsum_reg.sum(1, keepdims=True)
        mu = (wxsum + m[None] * tau) / wsum_reg[..., None]
        Sigma = (wxxsum + (V + m ** 2)[None] * tau) / wsum_reg[..., None] - mu ** 2
    return pi, mu, Sigma, qq


if __name__ == "__main__":
    # DirNIWNet(p=8, d=32, eps=0.1, load_proto=False)
    p, d, eps = 8, 32, 0.1
    B, N = 2, 16

    key = jax.random.PRNGKey(0)
    k_m, k_x = jax.random.split(key)
    m_param = 0.1 * jax.random.normal(k_m, (p, d), dtype=jnp.float32)
    v_raw = jnp.full((p, d), float(np.log(np.e - 1.0)), dtype=jnp.float32)
    data = jax.random.normal(k_x, (B, N, d), dtype=jnp.float32)

    # forward(): (m, V) — plain JAX (a standalone pallas_call for 8x32 floats is overhead)
    m_out, V_out = dirniw_forward(m_param, v_raw, eps)

    # map_em(): EM with the prior (forward() fused inside the kernel from V_ raw)
    pi, mu, Sigma, qq = dirniw_map_em(data, m_param, v_raw, eps=eps, num_iters=3, tau=1.0)
    jax.block_until_ready((m_out, V_out, pi, mu, Sigma, qq))

    # Validate against a pure-JAX reference of the PyTorch semantics.
    m_ref, V_ref = ref_forward(m_param, v_raw, eps)
    pi_r, mu_r, Sigma_r, qq_r = ref_map_em(data, m_ref, V_ref, num_iters=3, tau=1.0)

    assert np.allclose(np.asarray(m_out), np.asarray(m_ref), atol=1e-5)
    assert np.allclose(np.asarray(V_out), np.asarray(V_ref), atol=1e-5)
    assert np.allclose(np.asarray(pi), np.asarray(pi_r), rtol=1e-4, atol=1e-5)
    assert np.allclose(np.asarray(mu), np.asarray(mu_r), rtol=1e-4, atol=1e-4)
    assert np.allclose(np.asarray(Sigma), np.asarray(Sigma_r), rtol=1e-4, atol=1e-4)
    assert np.allclose(np.asarray(qq), np.asarray(qq_r), rtol=1e-4, atol=1e-4)

    print("KERNEL_OK")
</pallas_src>

<mosaic_0001>
module attributes {stable_mosaic.version = 11 : i64} {
  func.func @_map_em_kernel(%arg0: i32, %arg1: i32, %arg2: i32, %arg3: memref<1x128x32xf32, #tpu.memory_space<vmem>>, %arg4: memref<1x1x128xf32, #tpu.memory_space<vmem>>, %arg5: memref<8x32xf32, #tpu.memory_space<vmem>>, %arg6: memref<8x32xf32, #tpu.memory_space<vmem>>, %arg7: memref<1x8x1xf32, #tpu.memory_space<vmem>>, %arg8: memref<1x8x32xf32, #tpu.memory_space<vmem>>, %arg9: memref<1x8x32xf32, #tpu.memory_space<vmem>>, %arg10: memref<1x8x128xf32, #tpu.memory_space<vmem>>, %arg11: memref<8x1xf32, #tpu.memory_space<vmem>>, %arg12: memref<8x32xf32, #tpu.memory_space<vmem>>, %arg13: memref<8x32xf32, #tpu.memory_space<vmem>>, %arg14: memref<8x1xf32, #tpu.memory_space<vmem>>, %arg15: memref<8x32xf32, #tpu.memory_space<vmem>>, %arg16: memref<8x32xf32, #tpu.memory_space<vmem>>) attributes {dimension_semantics = [#tpu.dimension_semantics<parallel>, #tpu.dimension_semantics<arbitrary>, #tpu.dimension_semantics<arbitrary>], iteration_bounds = array<i64: 2, 3, 1>, scalar_prefetch = 0 : i64, scratch_operands = 6 : i64, tpu.core_type = #tpu.core_type<tc>, window_params = [{transform_indices = @transform_0, window_bounds = array<i64: 1, 128, 32>}, {transform_indices = @transform_1, window_bounds = array<i64: 1, 1, 128>}, {pipeline_mode = #tpu.pipeline_mode<synchronous>, transform_indices = @transform_2, window_bounds = array<i64: 8, 32>}, {pipeline_mode = #tpu.pipeline_mode<synchronous>, transform_indices = @transform_3, window_bounds = array<i64: 8, 32>}, {transform_indices = @transform_4, window_bounds = array<i64: 1, 8, 1>}, {transform_indices = @transform_5, window_bounds = array<i64: 1, 8, 32>}, {transform_indices = @transform_6, window_bounds = array<i64: 1, 8, 32>}, {transform_indices = @transform_7, window_bounds = array<i64: 1, 8, 128>}]} {
    %c0 = arith.constant 0 : index
    %c0_0 = arith.constant 0 : index
    %0 = vector.load %arg5[%c0, %c0_0] : memref<8x32xf32, #tpu.memory_space<vmem>>, vector<8x32xf32>
    %c0_i32 = arith.constant 0 : i32
    %1 = arith.cmpi eq, %arg1, %c0_i32 : i32
    %c0_i32_1 = arith.constant 0 : i32
    %2 = arith.cmpi eq, %arg2, %c0_i32_1 : i32
    %3 = arith.andi %1, %2 : i1
    %4 = arith.extui %3 : i1 to i32
    %c0_i32_2 = arith.constant 0 : i32
    %5 = arith.cmpi ne, %4, %c0_i32_2 : i32
    scf.if %5 {
      %cst_45 = arith.constant 1.250000e-01 : f32
      %72 = vector.broadcast %cst_45 : f32 to vector<8x1xf32>
      %c0_46 = arith.constant 0 : index
      %c0_47 = arith.constant 0 : index
      %73 = vector.load %arg11[%c0_46, %c0_47] : memref<8x1xf32, #tpu.memory_space<vmem>>, vector<8x1xf32>
      tpu.vector_store %arg11[%c0_46, %c0_47], %72 {strides = array<i32>} : memref<8x1xf32, #tpu.memory_space<vmem>>, vector<8x1xf32>,
      %c0_48 = arith.constant 0 : index
      %c0_49 = arith.constant 0 : index
      %74 = vector.load %arg12[%c0_48, %c0_49] : memref<8x32xf32, #tpu.memory_space<vmem>>, vector<8x32xf32>
      tpu.vector_store %arg12[%c0_48, %c0_49], %0 {strides = array<i32>} : memref<8x32xf32, #tpu.memory_space<vmem>>, vector<8x32xf32>,
      %c0_50 = arith.constant 0 : index
      %c0_51 = arith.constant 0 : index
      %75 = vector.load %arg6[%c0_50, %c0_51] : memref<8x32xf32, #tpu.memory_space<vmem>>, vector<8x32xf32>
      %cst_52 = arith.constant 0.000000e+00 : f32
      %76 = vector.broadcast %cst_52 : f32 to vector<8x32xf32>
      %77 = arith.maximumf %75, %76 : vector<8x32xf32>
      %78 = math.absf %75 : vector<8x32xf32>
      %cst_53 = arith.constant 0.000000e+00 : f32
      %79 = vector.broadcast %cst_53 : f32 to vector<8x32xf32>
      %80 = arith.subf %79, %78 : vector<8x32xf32>
      %81 = math.exp %80 : vector<8x32xf32>
      %cst_54 = arith.constant 1.000000e+00 : f32
      %82 = vector.broadcast %cst_54 : f32 to vector<8x32xf32>
      %83 = arith.addf %82, %81 : vector<8x32xf32>
      %84 = math.log %83 : vector<8x32xf32>
      %85 = arith.addf %77, %84 : vector<8x32xf32>
      %cst_55 = arith.constant 1.000000e-01 : f32
      %86 = vector.broadcast %cst_55 : f32 to vector<8x32xf32>
      %87 = arith.mulf %86, %85 : vector<8x32xf32>
      %c0_56 = arith.constant 0 : index
      %c0_57 = arith.constant 0 : index
      %88 = vector.load %arg13[%c0_56, %c0_57] : memref<8x32xf32, #tpu.memory_space<vmem>>, vector<8x32xf32>
      tpu.vector_store %arg13[%c0_56, %c0_57], %87 {strides = array<i32>} : memref<8x32xf32, #tpu.memory_space<vmem>>, vector<8x32xf32>,
    } else {
    }
    %c0_i32_3 = arith.constant 0 : i32
    %6 = arith.cmpi eq, %arg2, %c0_i32_3 : i32
    %7 = arith.extui %6 : i1 to i32
    %c0_i32_4 = arith.constant 0 : i32
    %8 = arith.cmpi ne, %7, %c0_i32_4 : i32
    scf.if %8 {
      %cst_45 = arith.constant 0.000000e+00 : f32
      %72 = vector.broadcast %cst_45 : f32 to vector<8x1xf32>
      %c0_46 = arith.constant 0 : index
      %c0_47 = arith.constant 0 : index
      %73 = vector.load %arg14[%c0_46, %c0_47] : memref<8x1xf32, #tpu.memory_space<vmem>>, vector<8x1xf32>
      tpu.vector_store %arg14[%c0_46, %c0_47], %72 {strides = array<i32>} : memref<8x1xf32, #tpu.memory_space<vmem>>, vector<8x1xf32>,
      %cst_48 = arith.constant 0.000000e+00 : f32
      %74 = vector.broadcast %cst_48 : f32 to vector<8x32xf32>
      %c0_49 = arith.constant 0 : index
      %c0_50 = arith.constant 0 : index
      %75 = vector.load %arg15[%c0_49, %c0_50] : memref<8x32xf32, #tpu.memory_space<vmem>>, vector<8x32xf32>
      tpu.vector_store %arg15[%c0_49, %c0_50], %74 {strides = array<i32>} : memref<8x32xf32, #tpu.memory_space<vmem>>, vector<8x32xf32>,
      %cst_51 = arith.constant 0.000000e+00 : f32
      %76 = vector.broadcast %cst_51 : f32 to vector<8x32xf32>
      %c0_52 = arith.constant 0 : index
      %c0_53 = arith.constant 0 : index
      %77 = vector.load %arg16[%c0_52, %c0_53] : memref<8x32xf32, #tpu.memory_space<vmem>>, vector<8x32xf32>
      tpu.vector_store %arg16[%c0_52, %c0_53], %76 {strides = array<i32>} : memref<8x32xf32, #tpu.memory_space<vmem>>, vector<8x32xf32>,
    } else {
    }
    %c0_5 = arith.constant 0 : index
    %c0_6 = arith.constant 0 : index
    %c0_7 = arith.constant 0 : index
    %9 = vector.load %arg3[%c0_5, %c0_6, %c0_7] : memref<1x128x32xf32, #tpu.memory_space<vmem>>, vector<1x128x32xf32>
    %10 = vector.shape_cast %9 : vector<1x128x32xf32> to vector<128x32xf32>
    %c0_8 = arith.constant 0 : index
    %c0_9 = arith.constant 0 : index
    %c0_10 = arith.constant 0 : index
    %11 = vector.load %arg4[%c0_8, %c0_9, %c0_10] : memref<1x1x128xf32, #tpu.memory_space<vmem>>, vector<1x1x128xf32>
    %12 = vector.shape_cast %11 : vector<1x1x128xf32> to vector<1x128xf32>
    %13 = arith.mulf %10, %10 : vector<128x32xf32>
    %c0_11 = arith.constant 0 : index
    %c0_12 = arith.constant 0 : index
    %14 = vector.load %arg12[%c0_11, %c0_12] : memref<8x32xf32, #tpu.memory_space<vmem>>, vector<8x32xf32>
    %c0_13 = arith.constant 0 : index
    %c0_14 = arith.constant 0 : index
    %15 = vector.load %arg13[%c0_13, %c0_14] : memref<8x32xf32, #tpu.memory_space<vmem>>, vector<8x32xf32>
    %16 = tpu.reciprocal %15 : vector<8x32xf32> -> vector<8x32xf32>
    %cst = arith.constant -5.000000e-01 : f32
    %17 = vector.broadcast %cst : f32 to vector<8x32xf32>
    %18 = arith.mulf %17, %16 : vector<8x32xf32>
    %19 = arith.mulf %14, %16 : vector<8x32xf32>
    %20 = math.log %15 : vector<8x32xf32>
    %21 = arith.mulf %14, %14 : vector<8x32xf32>
    %22 = arith.mulf %21, %16 : vector<8x32xf32>
    %23 = arith.addf %20, %22 : vector<8x32xf32>
    %cst_15 = arith.constant dense<0.000000e+00> : vector<8xf32>
    %24 = vector.multi_reduction <add>, %23, %cst_15 [1] : vector<8x32xf32> to vector<8xf32>
    %25 = vector.shape_cast %24 : vector<8xf32> to vector<8x1xf32>
    %cst_16 = arith.constant 5.000000e-01 : f32
    %26 = vector.broadcast %cst_16 : f32 to vector<8x1xf32>
    %27 = arith.mulf %26, %25 : vector<8x1xf32>
    %cst_17 = arith.constant -29.4060326 : f32
    %28 = vector.broadcast %cst_17 : f32 to vector<8x1xf32>
    %29 = arith.subf %28, %27 : vector<8x1xf32>
    %c0_18 = arith.constant 0 : index
    %c0_19 = arith.constant 0 : index
    %30 = vector.load %arg11[%c0_18, %c0_19] : memref<8x1xf32, #tpu.memory_space<vmem>>, vector<8x1xf32>
    %31 = math.log %30 : vector<8x1xf32>
    %32 = arith.addf %29, %31 : vector<8x1xf32>
    %cst_20 = arith.constant dense<0.000000e+00> : vector<8x128xf32>
    %33 = tpu.matmul %18, %13, %cst_20 {dimension_numbers = #tpu.dot_dimension_numbers<[1], [1], [0], [0], [0, 0, 1, 0], [], []>} : vector<8x32xf32>, vector<128x32xf32>, vector<8x128xf32> -> vector<8x128xf32>
    %cst_21 = arith.constant dense<0.000000e+00> : vector<8x128xf32>
    %34 = tpu.matmul %19, %10, %cst_21 {dimension_numbers = #tpu.dot_dimension_numbers<[1], [1], [0], [0], [0, 0, 1, 0], [], []>} : vector<8x32xf32>, vector<128x32xf32>, vector<8x128xf32> -> vector<8x128xf32>
    %35 = arith.addf %33, %34 : vector<8x128xf32>
    %36 = vector.broadcast %32 : vector<8x1xf32> to vector<8x128xf32>
    %37 = arith.addf %35, %36 : vector<8x128xf32>
    %cst_22 = arith.constant dense<0xFF800000> : vector<128xf32>
    %38 = vector.multi_reduction <maximumf>, %37, %cst_22 [0] : vector<8x128xf32> to vector<128xf32>
    %39 = vector.shape_cast %38 : vector<128xf32> to vector<1x128xf32>
    %40 = vector.broadcast %39 : vector<1x128xf32> to vector<8x128xf32>
    %41 = arith.subf %37, %40 : vector<8x128xf32>
    %42 = math.exp %41 : vector<8x128xf32>
    %cst_23 = arith.constant dense<0.000000e+00> : vector<128xf32>
    %43 = vector.multi_reduction <add>, %42, %cst_23 [0] : vector<8x128xf32> to vector<128xf32>
    %44 = vector.shape_cast %43 : vector<128xf32> to vector<1x128xf32>
    %45 = tpu.reciprocal %44 {approx = true} : vector<1x128xf32> -> vector<1x128xf32>
    %46 = arith.mulf %44, %45 : vector<1x128xf32>
    %cst_24 = arith.constant 2.000000e+00 : f32
    %47 = vector.broadcast %cst_24 : f32 to vector<1x128xf32>
    %48 = arith.subf %47, %46 : vector<1x128xf32>
    %49 = arith.mulf %45, %48 : vector<1x128xf32>
    %50 = arith.mulf %12, %49 : vector<1x128xf32>
    %51 = vector.broadcast %50 : vector<1x128xf32> to vector<8x128xf32>
    %52 = arith.mulf %42, %51 : vector<8x128xf32>
    %c0_25 = arith.constant 0 : index
    %c0_26 = arith.constant 0 : index
    %c0_27 = arith.constant 0 : index
    %53 = vector.load %arg10[%c0_25, %c0_26, %c0_27] : memref<1x8x128xf32, #tpu.memory_space<vmem>>, vector<1x8x128xf32>
    %54 = vector.shape_cast %53 : vector<1x8x128xf32> to vector<8x128xf32>
    %55 = vector.shape_cast %52 : vector<8x128xf32> to vector<1x8x128xf32>
    tpu.vector_store %arg10[%c0_25, %c0_26, %c0_27], %55 {strides = array<i32>} : memref<1x8x128xf32, #tpu.memory_space<vmem>>, vector<1x8x128xf32>,
    %c0_28 = arith.constant 0 : index
    %c0_29 = arith.constant 0 : index
    %56 = vector.load %arg14[%c0_28, %c0_29] : memref<8x1xf32, #tpu.memory_space<vmem>>, vector<8x1xf32>
    %cst_30 = arith.constant dense<0.000000e+00> : vector<8xf32>
    %57 = vector.multi_reduction <add>, %52, %cst_30 [1] : vector<8x128xf32> to vector<8xf32>
    %58 = vector.shape_cast %57 : vector<8xf32> to vector<8x1xf32>
    %59 = arith.addf %56, %58 : vector<8x1xf32>
    %c0_31 = arith.constant 0 : index
    %c0_32 = arith.constant 0 : index
    %60 = vector.load %arg14[%c0_31, %c0_32] : memref<8x1xf32, #tpu.memory_space<vmem>>, vector<8x1xf32>
    tpu.vector_store %arg14[%c0_31, %c0_32], %59 {strides = array<i32>} : memref<8x1xf32, #tpu.memory_space<vmem>>, vector<8x1xf32>,
    %c0_33 = arith.constant 0 : index
    %c0_34 = arith.constant 0 : index
    %61 = vector.load %arg15[%c0_33, %c0_34] : memref<8x32xf32, #tpu.memory_space<vmem>>, vector<8x32xf32>
    %cst_35 = arith.constant dense<0.000000e+00> : vector<8x32xf32>
    %62 = tpu.matmul %52, %10, %cst_35 {dimension_numbers = #tpu.dot_dimension_numbers<[1], [0], [0], [1], [0, 0, 1, 1], [], []>} : vector<8x128xf32>, vector<128x32xf32>, vector<8x32xf32> -> vector<8x32xf32>
    %63 = arith.addf %61, %62 : vector<8x32xf32>
    %c0_36 = arith.constant 0 : index
    %c0_37 = arith.constant 0 : index
    %64 = vector.load %arg15[%c0_36, %c0_37] : memref<8x32xf32, #tpu.memory_space<vmem>>, vector<8x32xf32>
    tpu.vector_store %arg15[%c0_36, %c0_37], %63 {strides = array<i32>} : memref<8x32xf32, #tpu.memory_space<vmem>>, vector<8x32xf32>,
    %c0_38 = arith.constant 0 : index
    %c0_39 = arith.constant 0 : index
    %65 = vector.load %arg16[%c0_38, %c0_39] : memref<8x32xf32, #tpu.memory_space<vmem>>, vector<8x32xf32>
    %cst_40 = arith.constant dense<0.000000e+00> : vector<8x32xf32>
    %66 = tpu.matmul %52, %13, %cst_40 {dimension_numbers = #tpu.dot_dimension_numbers<[1], [0], [0], [1], [0, 0, 1, 1], [], []>} : vector<8x128xf32>, vector<128x32xf32>, vector<8x32xf32> -> vector<8x32xf32>
    %67 = arith.addf %65, %66 : vector<8x32xf32>
    %c0_41 = arith.constant 0 : index
    %c0_42 = arith.constant 0 : index
    %68 = vector.load %arg16[%c0_41, %c0_42] : memref<8x32xf32, #tpu.memory_space<vmem>>, vector<8x32xf32>
    tpu.vector_store %arg16[%c0_41, %c0_42], %67 {strides = array<i32>} : memref<8x32xf32, #tpu.memory_space<vmem>>, vector<8x32xf32>,
    %c0_i32_43 = arith.constant 0 : i32
    %69 = arith.cmpi eq, %arg2, %c0_i32_43 : i32
    %70 = arith.extui %69 : i1 to i32
    %c0_i32_44 = arith.constant 0 : i32
    %71 = arith.cmpi ne, %70, %c0_i32_44 : i32
    scf.if %71 {
      %c0_45 = arith.constant 0 : index
      %c0_46 = arith.constant 0 : index
      %72 = vector.load %arg6[%c0_45, %c0_46] : memref<8x32xf32, #tpu.memory_space<vmem>>, vector<8x32xf32>
      %cst_47 = arith.constant 0.000000e+00 : f32
      %73 = vector.broadcast %cst_47 : f32 to vector<8x32xf32>
      %74 = arith.maximumf %72, %73 : vector<8x32xf32>
      %75 = math.absf %72 : vector<8x32xf32>
      %cst_48 = arith.constant 0.000000e+00 : f32
      %76 = vector.broadcast %cst_48 : f32 to vector<8x32xf32>
      %77 = arith.subf %76, %75 : vector<8x32xf32>
      %78 = math.exp %77 : vector<8x32xf32>
      %cst_49 = arith.constant 1.000000e+00 : f32
      %79 = vector.broadcast %cst_49 : f32 to vector<8x32xf32>
      %80 = arith.addf %79, %78 : vector<8x32xf32>
      %81 = math.log %80 : vector<8x32xf32>
      %82 = arith.addf %74, %81 : vector<8x32xf32>
      %cst_50 = arith.constant 1.000000e-01 : f32
      %83 = vector.broadcast %cst_50 : f32 to vector<8x32xf32>
      %84 = arith.mulf %83, %82 : vector<8x32xf32>
      %c0_51 = arith.constant 0 : index
      %c0_52 = arith.constant 0 : index
      %85 = vector.load %arg14[%c0_51, %c0_52] : memref<8x1xf32, #tpu.memory_space<vmem>>, vector<8x1xf32>
      %cst_53 = arith.constant 1.000000e+00 : f32
      %86 = vector.broadcast %cst_53 : f32 to vector<8x1xf32>
      %87 = arith.addf %85, %86 : vector<8x1xf32>
      %88 = tpu.reciprocal %87 : vector<8x1xf32> -> vector<8x1xf32>
      %89 = vector.shape_cast %87 : vector<8x1xf32> to vector<1x8x1xf32>
      %cst_54 = arith.constant dense<0.000000e+00> : vector<1xf32>
      %90 = vector.multi_reduction <add>, %89, %cst_54 [1, 2] : vector<1x8x1xf32> to vector<1xf32>
      %91 = vector.shape_cast %90 : vector<1xf32> to vector<1x1x1xf32>
      %92 = vector.extract %91[0, 0, 0] : f32 from vector<1x1x1xf32>
      %93 = vector.broadcast %92 : f32 to vector<1x1xf32>
      %94 = tpu.reciprocal %93 : vector<1x1xf32> -> vector<1x1xf32>
      %95 = vector.broadcast %94 : vector<1x1xf32> to vector<8x1xf32>
      %96 = arith.mulf %87, %95 : vector<8x1xf32>
      %c0_55 = arith.constant 0 : index
      %c0_56 = arith.constant 0 : index
      %97 = vector.load %arg15[%c0_55, %c0_56] : memref<8x32xf32, #tpu.memory_space<vmem>>, vector<8x32xf32>
      %cst_57 = arith.constant 1.000000e+00 : f32
      %98 = vector.broadcast %cst_57 : f32 to vector<8x32xf32>
      %99 = arith.mulf %0, %98 : vector<8x32xf32>
      %100 = arith.addf %97, %99 : vector<8x32xf32>
      %101 = vector.broadcast %88 : vector<8x1xf32> to vector<8x32xf32>
      %102 = arith.mulf %100, %101 : vector<8x32xf32>
      %c0_58 = arith.constant 0 : index
      %c0_59 = arith.constant 0 : index
      %103 = vector.load %arg16[%c0_58, %c0_59] : memref<8x32xf32, #tpu.memory_space<vmem>>, vector<8x32xf32>
      %104 = arith.mulf %0, %0 : vector<8x32xf32>
      %105 = arith.addf %84, %104 : vector<8x32xf32>
      %cst_60 = arith.constant 1.000000e+00 : f32
      %106 = vector.broadcast %cst_60 : f32 to vector<8x32xf32>
      %107 = arith.mulf %105, %106 : vector<8x32xf32>
      %108 = arith.addf %103, %107 : vector<8x32xf32>
      %109 = vector.broadcast %88 : vector<8x1xf32> to vector<8x32xf32>
      %110 = arith.mulf %108, %109 : vector<8x32xf32>
      %111 = arith.mulf %102, %102 : vector<8x32xf32>
      %112 = arith.subf %110, %111 : vector<8x32xf32>
      %cst_61 = arith.constant 1.000000e-30 : f32
      %113 = vector.broadcast %cst_61 : f32 to vector<8x32xf32>
      %114 = arith.maximumf %112, %113 : vector<8x32xf32>
      %c0_62 = arith.constant 0 : index
      %c0_63 = arith.constant 0 : index
      %115 = vector.load %arg11[%c0_62, %c0_63] : memref<8x1xf32, #tpu.memory_space<vmem>>, vector<8x1xf32>
      tpu.vector_store %arg11[%c0_62, %c0_63], %96 {strides = array<i32>} : memref<8x1xf32, #tpu.memory_space<vmem>>, vector<8x1xf32>,
      %c0_64 = arith.constant 0 : index
      %c0_65 = arith.constant 0 : index
      %116 = vector.load %arg12[%c0_64, %c0_65] : memref<8x32xf32, #tpu.memory_space<vmem>>, vector<8x32xf32>
      tpu.vector_store %arg12[%c0_64, %c0_65], %102 {strides = array<i32>} : memref<8x32xf32, #tpu.memory_space<vmem>>, vector<8x32xf32>,
      %c0_66 = arith.constant 0 : index
      %c0_67 = arith.constant 0 : index
      %117 = vector.load %arg13[%c0_66, %c0_67] : memref<8x32xf32, #tpu.memory_space<vmem>>, vector<8x32xf32>
      tpu.vector_store %arg13[%c0_66, %c0_67], %114 {strides = array<i32>} : memref<8x32xf32, #tpu.memory_space<vmem>>, vector<8x32xf32>,
      %c0_68 = arith.constant 0 : index
      %c0_69 = arith.constant 0 : index
      %c0_70 = arith.constant 0 : index
      %118 = vector.load %arg7[%c0_68, %c0_69, %c0_70] : memref<1x8x1xf32, #tpu.memory_space<vmem>>, vector<1x8x1xf32>
      %119 = vector.shape_cast %118 : vector<1x8x1xf32> to vector<8x1xf32>
      %120 = vector.shape_cast %96 : vector<8x1xf32> to vector<1x8x1xf32>
      tpu.vector_store %arg7[%c0_68, %c0_69, %c0_70], %120 {strides = array<i32>} : memref<1x8x1xf32, #tpu.memory_space<vmem>>, vector<1x8x1xf32>,
      %c0_71 = arith.constant 0 : index
      %c0_72 = arith.constant 0 : index
      %c0_73 = arith.constant 0 : index
      %121 = vector.load %arg8[%c0_71, %c0_72, %c0_73] : memref<1x8x32xf32, #tpu.memory_space<vmem>>, vector<1x8x32xf32>
      %122 = vector.shape_cast %121 : vector<1x8x32xf32> to vector<8x32xf32>
      %123 = vector.shape_cast %102 : vector<8x32xf32> to vector<1x8x32xf32>
      tpu.vector_store %arg8[%c0_71, %c0_72, %c0_73], %123 {strides = array<i32>} : memref<1x8x32xf32, #tpu.memory_space<vmem>>, vector<1x8x32xf32>,
      %c0_74 = arith.constant 0 : index
      %c0_75 = arith.constant 0 : index
      %c0_76 = arith.constant 0 : index
      %124 = vector.load %arg9[%c0_74, %c0_75, %c0_76] : memref<1x8x32xf32, #tpu.memory_space<vmem>>, vector<1x8x32xf32>
      %125 = vector.shape_cast %124 : vector<1x8x32xf32> to vector<8x32xf32>
      %126 = vector.shape_cast %114 : vector<8x32xf32> to vector<1x8x32xf32>
      tpu.vector_store %arg9[%c0_74, %c0_75, %c0_76], %126 {strides = array<i32>} : memref<1x8x32xf32, #tpu.memory_space<vmem>>, vector<1x8x32xf32>,
    } else {
    }
    return
  }
  func.func @transform_0(%arg0: i32, %arg1: i32, %arg2: i32) -> (i32, i32, i32) {
    %c0_i32 = arith.constant 0 : i32
    %c0_i32_0 = arith.constant 0 : i32
    return %arg0, %arg2, %c0_i32 : i32, i32, i32
  }
  func.func @transform_1(%arg0: i32, %arg1: i32, %arg2: i32) -> (i32, i32, i32) {
    %c0_i32 = arith.constant 0 : i32
    %c0_i32_0 = arith.constant 0 : i32
    return %arg0, %c0_i32, %arg2 : i32, i32, i32
  }
  func.func @transform_2(%arg0: i32, %arg1: i32, %arg2: i32) -> (i32, i32) {
    %c0_i32 = arith.constant 0 : i32
    %c0_i32_0 = arith.constant 0 : i32
    %c0_i32_1 = arith.constant 0 : i32
    return %c0_i32, %c0_i32_0 : i32, i32
  }
  func.func @transform_3(%arg0: i32, %arg1: i32, %arg2: i32) -> (i32, i32) {
    %c0_i32 = arith.constant 0 : i32
    %c0_i32_0 = arith.constant 0 : i32
    %c0_i32_1 = arith.constant 0 : i32
    return %c0_i32, %c0_i32_0 : i32, i32
  }
  func.func @transform_4(%arg0: i32, %arg1: i32, %arg2: i32) -> (i32, i32, i32) {
    %c0_i32 = arith.constant 0 : i32
    %c0_i32_0 = arith.constant 0 : i32
    %c0_i32_1 = arith.constant 0 : i32
    return %arg0, %c0_i32, %c0_i32_0 : i32, i32, i32
  }
  func.func @transform_5(%arg0: i32, %arg1: i32, %arg2: i32) -> (i32, i32, i32) {
    %c0_i32 = arith.constant 0 : i32
    %c0_i32_0 = arith.constant 0 : i32
    %c0_i32_1 = arith.constant 0 : i32
    return %arg0, %c0_i32, %c0_i32_0 : i32, i32, i32
  }
  func.func @transform_6(%arg0: i32, %arg1: i32, %arg2: i32) -> (i32, i32, i32) {
    %c0_i32 = arith.constant 0 : i32
    %c0_i32_0 = arith.constant 0 : i32
    %c0_i32_1 = arith.constant 0 : i32
    return %arg0, %c0_i32, %c0_i32_0 : i32, i32, i32
  }
  func.func @transform_7(%arg0: i32, %arg1: i32, %arg2: i32) -> (i32, i32, i32) {
    %c0_i32 = arith.constant 0 : i32
    %c0_i32_0 = arith.constant 0 : i32
    return %arg0, %c0_i32, %arg2 : i32, i32, i32
  }
}

</mosaic_0001>

<bundles_post_ra>
// kernel: tpu_custom_call.1
= control target key start
LH: loop header
LB: loop body
LE: loop exit
PB: predicated region body
PF: predicated region fallthrough
CT: control target
= control target key end

     0   :  { %s2289_s0 = inlined_call_operand.vmem [shape: f32[2,128,32], index: 0, kind: input, shape index: {}]   ;;  %s2290_s1 = inlined_call_operand.vmem [shape: f32[2,1,128], index: 1, kind: input, shape index: {}]   ;;  %s2291_s2 = inlined_call_operand.vmem [shape: f32[8,32], index: 2, kind: input, shape index: {}]   ;;  %s2292_s3 = inlined_call_operand.vmem [shape: f32[8,32], index: 3, kind: input, shape index: {}]   ;;  %s2293_s4 = inlined_call_operand.vmem [shape: f32[2,8,1], index: 4, kind: output, shape index: {0}]   ;;  %s2294_s5 = inlined_call_operand.hbm [shape: f32[2,8,32], index: 5, kind: output, shape index: {1}]   ;;  %s2295_s6 = inlined_call_operand.hbm [shape: f32[2,8,32], index: 6, kind: output, shape index: {2}]   ;;  %s2296_s7 = inlined_call_operand.hbm [shape: f32[2,8,128], index: 7, kind: output, shape index: {3}]  }
   0x1   :  { %2303 = sst [smem:[#allocation20_spill]] %s2291_s2 }
   0x2   :  { %13 = vsyncpa [#allocation9], 0 }
   0x3   :  { %15 = vsyncpa [#allocation9 + $0x1], 0 }
   0x4   :  { %16 = vsyncpa [#allocation11], 0 }
   0x5   :  { %18 = vsyncpa [#allocation11 + $0x1], 0  ;;  %s1858_s24 = smov 0   ;;  %s1860_s25 = smov 0  }
   0x6   :  { %s1862_s26 = smov 0   ;;  %s1864_s27 = smov 0  }
   0x7   :  { %s1866_s28 = smov 0   ;;  %s1868_s29 = smov 0  }
   0x8   :  { %s1870_s30 = smov 0   ;;  %s1872_s8 = smov 0  }
   0x9 LB: > { %2304 = sst [smem:[#allocation15_spill]] %s1800_s29  ;;  %s2298_s9 = sadd.s32 4294967295, %s1808_s8   ;;  %s1808_s8 = sphi %s1872_s8, %s24_s8   ;;  %s1804_s30 = sphi %s1870_s30, %s2321_s30   ;;  %s1800_s29 = sphi %s1868_s29, %s2320_s29   ;;  %s1796_s28 = sphi %s1866_s28, %s2319_s28   ;;  %s1792_s27 = sphi %s1864_s27, %s2325_s27   ;;  %s1788_s26 = sphi %s1862_s26, %s2324_s26   ;;  %s1784_s25 = sphi %s1860_s25, %s2323_s25   ;;  %s1780_s24 = sphi %s1858_s24, %s2322_s24  }
   0xa   : > { %2305 = sst [smem:[#allocation16_spill]] %s1804_s30  ;;  %s2297_s10 = sadd.s32 4294967294, %s1808_s8  }
   0xb   : > { %s39_s11 = sadd.s32 1, %s1800_s29  ;;  %s43_s12 = sadd.s32 1, %s1804_s30 }
   0xc   : > { %p41_p0 = scmp.ge.s32.totalorder %s39_s11, 3  ;;  %p184_p1 = scmp.ne.s32.totalorder %s1788_s26, %s1784_s25 }
   0xd   : > { %p185_p2 = scmp.eq.s32.totalorder %s2298_s9, 5  ;;  %p190_p4 = scmp.ne.s32.totalorder %s1784_s25, %s1780_s24 }
   0xe   : > { %s2327_s11 = smov (%p41_p0, %s39_s11), 0  ;;  %s2329_s12 = smov (!%p41_p0, %s43_s12), %s1804_s30 }
   0xf   : > { %2306 = sst [smem:[#allocation17_spill]] %s2327_s11  ;;  %p1909_p3 = por %p185_p2, %p184_p1 }
  0x10   : > { %p45_p5 = scmp.ge.s32.totalorder %s2329_s12, 2  ;;  %p191_p6 = scmp.eq.s32.totalorder %s2297_s10, 5 }
  0x11   : > { %p1170_p7 = scmp.ge.s32.totalorder %s1808_s8, 1  ;;  %p291_p8 = scmp.lt.s32.totalorder %s1808_s8, 7 }
  0x12   : > { %s2331_s12 = smov (%p45_p5, %s2329_s12), 0  ;;  %p1921_p9 = por %p191_p6, %p190_p4 }
  0x13   : > { %2308 = sst [smem:[#allocation18_spill]] %s2331_s12  ;;  %p292_p10 = pnand %p1170_p7, %p291_p8 }
  0x14   : > { %s171_s15 = ssub.s32 %s1804_s30, %s2331_s12  ;;  %s174_s16 = sadd.s32 1, %s1788_s26 }
  0x15   : > { %p172_p11 = scmp.eq.s32.totalorder %s171_s15, 0  ;;  %295 = sbr.rel (%p292_p10) target bundleno = 817 (0x331), region = 36 }
  0x16   : > { %s2299_s18 = sand.u32 (!%p292_p10), 1, %s1784_s25   ;;  %p348_p12 = scmp.lt.s32.totalorder (!%p292_p10), %s1796_s28, 1 }
  0x17   : > { %s1929_s17 = scalar_select %p172_p11, %s1788_s26, %s174_s16  }
  0x18   : > { %s2311_s2 = sld [smem:[#allocation20_spill]] (!%p292_p10)  ;;  %s1940_s21 = sshll.u32 (!%p292_p10), %s2299_s18, 3 }
  0x19   : > { %2310 = sst [smem:[#allocation19_spill]] %s1929_s17  ;;  %p368_p13 = scmp.eq.s32.totalorder (!%p292_p10), %s1792_s27, 0 }
  0x1a   : > { %s332_s11 = scalar_lea.vmem (!%p292_p10), [#allocation8], %s1940_s21  ;;  %s339_s30 = scalar_lea.vmem (!%p292_p10), [#allocation10], %s1940_s21 }
  0x1b   : > { %s346_s29 = scalar_lea.vmem (!%p292_p10), [#allocation12], %s1940_s21 }
  0x1c   : > { %s1944_s22 = scalar_select %p348_p12, %s1796_s28, 1 }
  0x1d   : > { %373 = sbr.rel (!%p368_p13) target bundleno = 67 (0x43), region = 40  ;;  %vm374_vm0 = vcmask (%p368_p13), 7168   ;;  %vm376_vm1 = vcmask (%p368_p13), 261120   ;;  %v378_v1 = vld [vmem:[%s2292_s3] sm:$0xff] (%p368_p13)  ;;  %v1810_v2 = vmov (%p368_p13), 0.125  }
  0x1e   : > { %v1936_v0 = vld [vmem:[%s2311_s2] sm:$0xff]  ;;  %s1220_s23 = sshll.u32 %s1944_s22, 7  ;;  %s362_s10 = scalar_lea.vmem %s2290_s1, %s1944_s22  ;;  %375 = vst.msk [vmem:[#allocation2] sm:$0xff] (%p368_p13), %vm374_vm0, %v1810_v2  ;;  %v380_v3 = vand.u32 (%p368_p13), 2147483647, %v378_v1  ;;  %v379_v8 = vmax.f32 (%p368_p13), %v378_v1, 0.0 }
  0x1f   : > { %s1954_s9 = scalar_lea.vmem %s2289_s0, %s1220_s23  ;;  %s1176_s18 = sshll.u32 %s1944_s22, 3  ;;  %377 = vst.msk [vmem:[#allocation3] sm:$0xff] (%p368_p13), %vm376_vm1, %v1936_v0 }
  0x20   : > { %s1960_s27 = scalar_lea.vmem %s2293_s4, %s1176_s18  ;;  %v381_v4 = vsub.f32 (%p368_p13), 0.0, %v380_v3 }
  0x22   : > { %v382_v5 = vmul.f32 (%p368_p13), 1.442695, %v381_v4 }
  0x24   : > { %1630 = vpow2.f32 %v382_v5 }
  0x2e   : > { %v1631_v6 = vpop.eup %1630 }
  0x2f   : > { %v384_v7 = vadd.f32 1.0, %v1631_v6 }
  0x31   : > { %1632 = vlog2.f32 %v384_v7 }
  0x3b   : > { %v1633_v9 = vpop.eup %1632 }
  0x3c   : > { %v386_v10 = vmul.f32 0.6931472, %v1633_v9 }
  0x3e   : > { %v387_v11 = vadd.f32 %v386_v10, %v379_v8 }
  0x40   : > { %v388_v12 = vmul.f32 0.1, %v387_v11 }
  0x42   : > { %389 = vst.msk [vmem:[#allocation4] sm:$0xff] %vm376_vm1, %v388_v12 }
  0x43 PF: > { %vm395_vm2 = vcmask 261120   ;;  %v398_v13 = vld [vmem:[%s1954_s9] sm:$0xff]  ;;  %v399_v14 = vld [vmem:[%s1954_s9 + $0x8] sm:$0xff]  ;;  %v1811_v15 = vmov 0.0|0.0   ;;  %v1812_v21 = vmov 0.0   ;;  %v400_v22 = vld [vmem:[%s1954_s9 + $0x10] sm:$0xff] }
  0x44   : > { %1430 = vmatprep.subr.bf16.mxu0 %v1811_v15  ;;  %1462 = vmatprep.subr.bf16.mxu1 %v1811_v15  ;;  %v1975_v16 = vpack.c.bf16 %v399_v14, %v398_v13  ;;  %vm1979_vm3 = vmpackc.low %vm395_vm2, %vm395_vm2  ;;  %v415_v18 = vmul.f32 %v398_v13, %v398_v13  ;;  %v416_v19 = vmul.f32 %v399_v14, %v399_v14  ;;  %v401_v23 = vld [vmem:[%s1954_s9 + $0x18] sm:$0xff]  ;;  %vm1813_vm4 = vmmov 0   ;;  %v402_v31 = vld [vmem:[%s1954_s9 + $0x20] sm:$0xff]  ;;  %s2137_s17 = sshll.u32 %s1796_s28, 7  ;;  %s962_s18 = sshll.u32 %s332_s11, 4  ;;  %s2148_s18 = int_to_ptr.vmem [resolvable:$true] %s962_s18 }
  0x45   : > { %396 = vst.msk [vmem:[#allocation6] sm:$0xff] %vm395_vm2, %v1812_v21  ;;  %397 = vst.msk [vmem:[#allocation7] sm:$0xff] %vm395_vm2, %v1812_v21  ;;  %1322 = vmatprep.mubr.msk.f32.mxu0 %vm1813_vm4, %v1812_v21  ;;  %1357 = vmatprep.mubr.msk.f32.mxu1 %vm1813_vm4, %v1812_v21  ;;  %v417_v25 = vmul.f32 %v400_v22, %v400_v22  ;;  %v418_v26 = vmul.f32 %v401_v23, %v401_v23  ;;  %v2002_v27 = vld [vmem:[#allocation3] sm:$0xff]  ;;  %v404_v43 = vld [vmem:[%s1954_s9 + $0x30] sm:$0xff]  ;;  %v1814_v59 = vmov 0   ;;  %vm393_vm5 = vcmask 7168   ;;  %s2146_s16 = scalar_lea.hbm %s2294_s5, %s2137_s17 }
  0x46   : > { %1433 = vmatpush3.bf16.xpose.msk.msra.mxu0 %vm1979_vm3, %v1975_v16  ;;  %v1996_v24 = vpack.c.bf16 %v416_v19, %v415_v18  ;;  %v2005_v28 = vpack.c.bf16 %v401_v23, %v400_v22  ;;  %v438_v29 = vmul.f32 %v2002_v27, %v2002_v27  ;;  %v403_v32 = vld [vmem:[%s1954_s9 + $0x28] sm:$0xff]  ;;  %v419_v36 = vmul.f32 %v402_v31, %v402_v31  ;;  %v405_v44 = vld [vmem:[%s1954_s9 + $0x38] sm:$0xff]  ;;  %v406_v49 = vld [vmem:[%s1954_s9 + $0x40] sm:$0xff]  ;;  %s2314_s28 = sadd.s32 4294967295, %s1808_s8   ;;  %s2160_s20 = sshll.u32 %s339_s30, 4  ;;  %s2194_s20 = int_to_ptr.vmem [resolvable:$true] %s2160_s20 }
  0x47   : > { %1434 = vmatprep.subr.bf16.mxu0 %v1811_v15  ;;  %v2009_v30 = vpack.c.bf16 %v418_v26, %v417_v25  ;;  %v420_v37 = vmul.f32 %v403_v32, %v403_v32  ;;  %v2024_v39 = vpack.c.bf16 %v403_v32, %v402_v31  ;;  %v421_v45 = vmul.f32 %v404_v43, %v404_v43  ;;  %v407_v50 = vld [vmem:[%s1954_s9 + $0x48] sm:$0xff]  ;;  %v408_v55 = vld [vmem:[%s1954_s9 + $0x50] sm:$0xff]  ;;  %v409_v56 = vld [vmem:[%s1954_s9 + $0x58] sm:$0xff]  ;;  %s2156_s19 = sand.u32 1, %s2314_s28   ;;  %s2315_s15 = sand.u32 1, %s1784_s25  }
  0x48   : > { %1465 = vmatpush3.bf16.xpose.msk.msra.mxu1 %vm1979_vm3, %v1996_v24  ;;  %v422_v46 = vmul.f32 %v405_v44, %v405_v44  ;;  %v2039_v47 = vpack.c.bf16 %v405_v44, %v404_v43  ;;  %v423_v51 = vmul.f32 %v406_v49, %v406_v49  ;;  %v424_v52 = vmul.f32 %v407_v50, %v407_v50  ;;  %v410_v62 = vld [vmem:[%s1954_s9 + $0x60] sm:$0xff]  ;;  %v411_v63 = vld [vmem:[%s1954_s9 + $0x68] sm:$0xff]  ;;  %v412_v5 = vld [vmem:[%s1954_s9 + $0x70] sm:$0xff]  ;;  %s936_s2 = scalar_lea.sflag [#allocation9], %s2315_s15 }
  0x49   : > { %v432_v20 = vld [vmem:[#allocation4] sm:$0xff]  ;;  %1466 = vmatprep.subr.bf16.mxu1 %v1811_v15  ;;  %v2026_v41 = vpack.c.bf16 %v420_v37, %v419_v36  ;;  %v1447_v53 = vpack.c.bf16 %v407_v50, %v406_v49  ;;  %v425_v57 = vmul.f32 %v408_v55, %v408_v55  ;;  %v426_v58 = vmul.f32 %v409_v56, %v409_v56  ;;  %v413_v6 = vld [vmem:[%s1954_s9 + $0x78] sm:$0xff]  ;;  %v447_v13 = vld [vmem:[#allocation2] sm:$0xff]  ;;  %s1654_s9 = scalar_lea.vmem %s2148_s18, 128 }
  0x4a   : > { %1636 = vrcp.f32 %v432_v20  ;;  %v2041_v48 = vpack.c.bf16 %v422_v46, %v421_v45  ;;  %v1479_v54 = vpack.c.bf16 %v424_v52, %v423_v51  ;;  %1634 = vset.pattern.permute.xlu0 %v1814_v59  ;;  %v1451_v60 = vpack.c.bf16 %v409_v56, %v408_v55  ;;  %1635 = vset.pattern.permute.xlu1 %v1814_v59  ;;  %p1655_p0 = scmp.ne.s32.totalorder %s2148_s18, %s1654_s9 }
  0x4b   : > { %1638 = vlog2.f32 %v432_v20  ;;  %v1483_v61 = vpack.c.bf16 %v426_v58, %v425_v57  ;;  %v427_v1 = vmul.f32 %v410_v62, %v410_v62  ;;  %v428_v2 = vmul.f32 %v411_v63, %v411_v63  ;;  %394 = vst.msk [vmem:[#allocation5] sm:$0xff] %vm393_vm5, %v1812_v21 }
  0x4c   : > { %v1455_v3 = vpack.c.bf16 %v411_v63, %v410_v62  ;;  %v429_v7 = vmul.f32 %v412_v5, %v412_v5  ;;  %v430_v8 = vmul.f32 %v413_v6, %v413_v6  ;;  %v1459_v9 = vpack.c.bf16 %v413_v6, %v412_v5  ;;  %v806_v62 = vld [vmem:[#allocation7] sm:$0xff]  ;;  %v882_v5 = vld [vmem:[%s2292_s3] sm:$0xff]  ;;  %p1656_p1 = pnand %p1655_p0, %p1909_p3 }
  0x4d   : > { %v1487_v4 = vpack.c.bf16 %v428_v2, %v427_v1  ;;  %1640 = vlog2.f32 %v447_v13  ;;  %v720_v43 = vlaneseq  ;;  %v884_v6 = vand.u32 2147483647, %v882_v5 }
  0x4e   : > { %1437 = vmatpush3.bf16.xpose.msk.msra.mxu0 %vm1979_vm3, %v2005_v28  ;;  %v1491_v10 = vpack.c.bf16 %v430_v8, %v429_v7  ;;  %p1657_p2 = pneg %p1656_p1 }
  0x4f   : > { %1438 = vmatprep.subr.bf16.mxu0 %v1811_v15  ;;  %v721_v46 = vshrl.u32 %v720_v43, 7  ;;  %v885_v7 = vsub.f32 0.0, %v884_v6 }
  0x50   : > { %1469 = vmatpush3.bf16.xpose.msk.msra.mxu1 %vm1979_vm3, %v2009_v30 }
  0x51   : > { %1470 = vmatprep.subr.bf16.mxu1 %v1811_v15  ;;  %v722_v50 = vsub.s32 0, %v721_v46  ;;  %v886_v8 = vmul.f32 1.442695, %v885_v7 }
  0x54   : > { %v2016_v33 = vpop.eup %1636 }
  0x55   : > { %v1639_v34 = vpop.eup %1638  ;;  %v439_v35 = vmul.f32 %v2016_v33, %v438_v29  ;;  %v435_v11 = vmul.f32 %v2016_v33, %v2002_v27  ;;  %v434_v12 = vmul.f32 -0.5, %v2016_v33 }
  0x56   : > { %v437_v38 = vmul.f32 0.6931472, %v1639_v34  ;;  %1441 = vmatpush3.bf16.xpose.msk.msra.mxu0 %vm1979_vm3, %v2024_v39 }
  0x57   : > { %1442 = vmatprep.subr.bf16.mxu0 %v1811_v15  ;;  %v1641_v14 = vpop.eup %1640 }
  0x58   : > { %v440_v40 = vadd.f32 %v439_v35, %v437_v38  ;;  %1473 = vmatpush3.bf16.xpose.msk.msra.mxu1 %vm1979_vm3, %v2026_v41  ;;  %v449_v17 = vmul.f32 0.6931472, %v1641_v14 }
  0x59   : > { %1474 = vmatprep.subr.bf16.mxu1 %v1811_v15 }
  0x5a   : > { %v442_v42 = vsel %vm395_vm2, %v440_v40, 0.0 }
  0x5b   : > { %443 = vadd.xlane.f32.xlu0 %v442_v42 }
  0x5e   : > { %1445 = vmatpush3.bf16.xpose.msk.msra.mxu0 %vm1979_vm3, %v2039_v47 }
  0x5f   : > { %1446 = vmatprep.subr.bf16.mxu0 %v1811_v15 }
  0x60   : > { %1477 = vmatpush3.bf16.xpose.msk.msra.mxu1 %vm1979_vm3, %v2041_v48 }
  0x61   : > { %1478 = vmatprep.subr.bf16.mxu1 %v1811_v15 }
  0x66   : > { %1449 = vmatpush3.bf16.xpose.msk.msra.mxu0 %vm1979_vm3, %v1447_v53 }
  0x67   : > { %1450 = vmatprep.subr.bf16.mxu0 %v1811_v15 }
  0x68   : > { %1481 = vmatpush3.bf16.xpose.msk.msra.mxu1 %vm1979_vm3, %v1479_v54 }
  0x69   : > { %1482 = vmatprep.subr.bf16.mxu1 %v1811_v15 }
  0x6e   : > { %1453 = vmatpush3.bf16.xpose.msk.msra.mxu0 %vm1979_vm3, %v1451_v60 }
  0x6f   : > { %1454 = vmatprep.subr.bf16.mxu0 %v1811_v15 }
  0x70   : > { %1485 = vmatpush3.bf16.xpose.msk.msra.mxu1 %vm1979_vm3, %v1483_v61 }
  0x71   : > { %1486 = vmatprep.subr.bf16.mxu1 %v1811_v15 }
  0x76   : > { %1457 = vmatpush3.bf16.xpose.msk.msra.mxu0 %vm1979_vm3, %v1455_v3 }
  0x77   : > { %1458 = vmatprep.subr.bf16.mxu0 %v1811_v15 }
  0x78   : > { %1489 = vmatpush3.bf16.xpose.msk.msra.mxu1 %vm1979_vm3, %v1487_v4 }
  0x79   : > { %1490 = vmatprep.subr.bf16.mxu1 %v1811_v15 }
  0x7e   : > { %1461 = vmatpush3.bf16.xpose.msk.msra.mxu0 %vm1979_vm3, %v1459_v9 }
  0x7f   : > { %1494 = vmatprep.subr.bf16.mxu0 %v1811_v15 }
  0x80   : > { %1493 = vmatpush3.bf16.xpose.msk.msra.mxu1 %vm1979_vm3, %v1491_v10 }
  0x81   : > { %1518 = vmatprep.subr.bf16.mxu1 %v1811_v15 }
  0x85   : > { %1323 = vmatmul.mubr.msk.f32.vlgmr.msra.gmra.mrb[0].mxu0 %vm395_vm2, %v435_v11 }
  0x86   : > { %1496 = vmatpush3.bf16.msra.mxu0 %v1975_v16  ;;  %1392 = vmatprep.mubr.msk.f32.mxu0 %vm1813_vm4, %v1812_v21 }
  0x87   : > { %1358 = vmatmul.mubr.msk.f32.vlgmr.msra.gmra.mrb[0].mxu1 %vm395_vm2, %v434_v12  ;;  %1497 = vmatprep.subr.bf16.mxu0 %v1811_v15  ;;  %v883_v12 = vmax.f32 %v882_v5, 0.0 }
  0x88   : > { %1520 = vmatpush3.bf16.msra.mxu1 %v1996_v24  ;;  %1427 = vmatprep.mubr.msk.f32.mxu1 %vm1813_vm4, %v1812_v21 }
  0x89   : > { %1521 = vmatprep.subr.bf16.mxu1 %v1811_v15 }
  0x8a   : > { %1499 = vmatpush3.bf16.msra.mxu0 %v2005_v28 }
  0x8b   : > { %1500 = vmatprep.subr.bf16.mxu0 %v1811_v15 }
  0x8c   : > { %1523 = vmatpush3.bf16.msra.mxu1 %v2009_v30 }
  0x8d   : > { %1524 = vmatprep.subr.bf16.mxu1 %v1811_v15 }
  0x8e   : > { %1502 = vmatpush3.bf16.msra.mxu0 %v2024_v39 }
  0x8f   : > { %1503 = vmatprep.subr.bf16.mxu0 %v1811_v15 }
  0x90   : > { %1526 = vmatpush3.bf16.msra.mxu1 %v2026_v41 }
  0x91   : > { %1527 = vmatprep.subr.bf16.mxu1 %v1811_v15 }
  0x92   : > { %1505 = vmatpush3.bf16.msra.mxu0 %v2039_v47 }
  0x93   : > { %1506 = vmatprep.subr.bf16.mxu0 %v1811_v15 }
  0x94   : > { %1529 = vmatpush3.bf16.msra.mxu1 %v2041_v48  ;;  %v414_v48 = vld [vmem:[%s362_s10] sm:$0x1]  ;;  %s1815_s10 = smov [#allocation8]  }
  0x95   : > { %1530 = vmatprep.subr.bf16.mxu1 %v1811_v15  ;;  %s1658_s12 = sshll.u32 %s1815_s10, 4  ;;  %s1659_s12 = int_to_ptr.vmem [resolvable:$false] %s1658_s12 }
  0x96   : > { %1508 = vmatpush3.bf16.msra.mxu0 %v1447_v53  ;;  %s1660_s22 = scalar_lea.vmem %s1659_s12, 256  ;;  %p1661_p4 = scmp.lt.s32.totalorder %s2148_s18, %s1659_s12 }
  0x97   : > { %1509 = vmatprep.subr.bf16.mxu0 %v1811_v15  ;;  %p1662_p5 = scmp.lt.s32.totalorder %s1660_s22, %s1654_s9 }
  0x98   : > { %1532 = vmatpush3.bf16.msra.mxu1 %v1479_v54  ;;  %v727_v54 = vld [vmem:[#allocation5] sm:$0xff] }
  0x99   : > { %1533 = vmatprep.subr.bf16.mxu1 %v1811_v15  ;;  %p1663_p6 = por %p1662_p5, %p1661_p4 }
  0x9a   : > { %1511 = vmatpush3.bf16.msra.mxu0 %v1451_v60 }
  0x9b   : > { %1512 = vmatprep.subr.bf16.mxu0 %v1811_v15  ;;  %p1664_p7 = pnand %p1663_p6, %p1657_p2 }
  0x9c   : > { %1535 = vmatpush3.bf16.msra.mxu1 %v1483_v61  ;;  %v733_v61 = vld [vmem:[#allocation6] sm:$0xff] }
  0x9d   : > { %1536 = vmatprep.subr.bf16.mxu1 %v1811_v15 }
  0x9e   : > { %1514 = vmatpush3.bf16.msra.mxu0 %v1455_v3 }
  0x9f   : > { %1515 = vmatprep.subr.bf16.mxu0 %v1811_v15 }
  0xa0   : > { %1538 = vmatpush3.bf16.msra.mxu1 %v1487_v4 }
  0xa1   : > { %1539 = vmatprep.subr.bf16.mxu1 %v1811_v15 }
  0xa2   : > { %1517 = vmatpush3.bf16.msra.mxu0 %v1459_v9 }
  0xa4   : > { %1541 = vmatpush3.bf16.msra.mxu1 %v1491_v10 }
  0xe8   : > { %v444_v16 = vpop.xlane.xlu0 %443 }
  0xe9   : > { %v445_v18 = vmul.f32 0.5, %v444_v16 }
  0xeb   : > { %v446_v19 = vsub.f32 -29.406033, %v445_v18 }
  0xed   : > { %v450_v20 = vadd.f32 %v449_v17, %v446_v19  ;;  %v918_v17 = vmul.f32 %v1936_v0, %v1936_v0 }
  0xef   : > { %695 = vperm.xlu0 %1634, %v450_v20  }
 0x158   : > { %v568_v22 = vpop.f32.mrb[0].mxu0 }
 0x159   : > { %v1324_v23 = vpop.f32.mrb[1].mxu0 }
 0x15a   : > { %v689_v24 = vpop.f32.mrb[0].mxu1 }
 0x15b   : > { %v690_v25 = vadd.f32 %v689_v24, %v568_v22  ;;  %v1359_v26 = vpop.f32.mrb[1].mxu1 }
 0x16e   : > { %v696_v27 = vpop.permute.xlu0 %695 }
 0x16f   : > { %v698_v28 = vadd.f32 %v696_v27, %v690_v25 }
 0x171   : > { %v699_v29 = vrot.slane %v698_v28, 4 }
 0x173   : > { %v700_v15 = vmax.f32 %v698_v28, %v699_v29 }
 0x175   : > { %v701_v30 = vrot.slane %v700_v15, 2 }
 0x177   : > { %v702_v31 = vmax.f32 %v700_v15, %v701_v30 }
 0x179   : > { %v703_v32 = vrot.slane %v702_v31, 1 }
 0x17b   : > { %v704_v33 = vmax.f32 %v702_v31, %v703_v32 }
 0x17d   : > { %v705_v34 = vsub.f32 %v698_v28, %v704_v33 }
 0x17f   : > { %v706_v35 = vmul.f32 1.442695, %v705_v34 }
 0x181   : > { %1642 = vpow2.f32 %v706_v35 }
 0x18b   : > { %v1643_v36 = vpop.eup %1642 }
 0x18c   : > { %v708_v37 = vrot.slane %v1643_v36, 4 }
 0x18e   : > { %v709_v38 = vadd.f32 %v1643_v36, %v708_v37 }
 0x190   : > { %v710_v39 = vrot.slane %v709_v38, 2 }
 0x192   : > { %v711_v40 = vadd.f32 %v710_v39, %v709_v38 }
 0x194   : > { %v712_v41 = vrot.slane %v711_v40, 1 }
 0x196   : > { %v713_v42 = vadd.f32 %v712_v41, %v711_v40 }
 0x198   : > { %1644 = vrcp.f32 %v713_v42 }
 0x1a2   : > { %v1645_v44 = vpop.eup %1644 }
 0x1a3   : > { %v715_v45 = vmul.f32 %v1645_v44, %v713_v42 }
 0x1a5   : > { %v716_v47 = vsub.f32 2.0, %v715_v45 }
 0x1a7   : > { %v717_v49 = vmul.f32 %v1645_v44, %v716_v47 }
 0x1a9   : > { %v718_v51 = vmul.f32 %v717_v49, %v414_v48 }
 0x1ab   : > { %v723_v52 = vrot.slane %v718_v51, %v722_v50 }
 0x1ad   : > { %v725_v53 = vmul.f32 %v1643_v36, %v723_v52 }
 0x1af   : > { %728 = vadd.xlane.f32.xlu1 %v725_v53  ;;  %726 = vst [vmem:[%s346_s29] sm:$0xff] %v725_v53  ;;  %1393 = vmatmul.mubr.f32.vlgmr.msra.gmra.mrb[2].mxu0 %v725_v53 }
 0x1b0   : > { %1428 = vmatmul.mubr.f32.vlgmr.msra.gmra.mrb[2].mxu1 %v725_v53 }
 0x23c   : > { %v729_v55 = vpop.xlane.xlu1 %728 }
 0x23d   : > { %v730_v56 = vadd.f32 %v729_v55, %v727_v54 }
 0x23f   : > { %732 = vst.msk [vmem:[#allocation5] sm:$0xff] %vm393_vm5, %v730_v56 }
 0x246   : > { %v893_v57 = vld [vmem:[#allocation5] sm:$0xff] }
 0x247   : > { %v2124_v58 = vadd.f32 1.0, %v893_v57 }
 0x249   : > { %v896_v59 = vsel %vm393_vm5, %v2124_v58, 0.0  ;;  %1646 = vrcp.f32 %v2124_v58 }
 0x24a   : > { %897 = vadd.xlane.f32.xlu1 %v896_v59  ;;  %1648 = vpow2.f32 %v886_v8 }
 0x253   : > { %v1647_v60 = vpop.eup %1646 }
 0x254   : > { %v1649_v9 = vpop.eup %1648 }
 0x255   : > { %v888_v10 = vadd.f32 1.0, %v1649_v9 }
 0x257   : > { %1650 = vlog2.f32 %v888_v10 }
 0x25b   : > { %913 = vperm.xlu1 %1635, %v1647_v60  }
 0x261   : > { %v1651_v11 = vpop.eup %1650 }
 0x262   : > { %v890_v13 = vmul.f32 0.6931472, %v1651_v11 }
 0x264   : > { %v891_v14 = vadd.f32 %v890_v13, %v883_v12 }
 0x266   : > { %v892_v16 = vmul.f32 0.1, %v891_v14 }
 0x268   : > { %v919_v22 = vadd.f32 %v918_v17, %v892_v16 }
 0x282   : > { %v800_v63 = vpop.f32.mrb[2].mxu0 }
 0x283   : > { %v804_v21 = vadd.f32 %v800_v63, %v733_v61  ;;  %v873_v1 = vpop.f32.mrb[2].mxu1  ;;  %v1394_v2 = vpop.f32.mrb[3].mxu0 }
 0x284   : > { %v877_v3 = vadd.f32 %v873_v1, %v806_v62  ;;  %v1429_v4 = vpop.f32.mrb[3].mxu1 }
 0x285   : > { %805 = vst.msk [vmem:[#allocation6] sm:$0xff] %vm395_vm2, %v804_v21 }
 0x286   : > { %878 = vst.msk [vmem:[#allocation7] sm:$0xff] %vm395_vm2, %v877_v3 }
 0x28c   : > { %v909_v19 = vld [vmem:[#allocation6] sm:$0xff] }
 0x28d   : > { %v917_v23 = vld [vmem:[#allocation7] sm:$0xff]  ;;  %v910_v25 = vadd.f32 %v909_v19, %v1936_v0 }
 0x28e   : > { %v920_v28 = vadd.f32 %v919_v22, %v917_v23 }
 0x2d7   : > { %v898_v18 = vpop.xlane.xlu1 %897 }
 0x2d8   : > { %v899_v20 = vrot.slane %v898_v18, 4 }
 0x2da   : > { %v900_v24 = vadd.f32 %v899_v20, %v898_v18 }
 0x2db   : > { %v914_v26 = vpop.permute.xlu1 %913 }
 0x2dc   : > { %v901_v27 = vrot.slane %v900_v24, 2  ;;  %v916_v29 = vmul.f32 %v914_v26, %v910_v25  ;;  %v921_v15 = vmul.f32 %v920_v28, %v914_v26 }
 0x2de   : > { %v922_v30 = vmul.f32 %v916_v29, %v916_v29  ;;  %926 = vst.msk [vmem:[#allocation3] sm:$0xff] %vm395_vm2, %v916_v29  ;;  %929 = vst.msk [vmem:[%s332_s11] sm:$0xff] %vm395_vm2, %v916_v29  ;;  %v902_v0 = vadd.f32 %v901_v27, %v900_v24 }
 0x2df   : > { %1667 = shalt.err (!%p1664_p7)
}
 0x2e0   : > { %s1668_s11 = scalar_lea.hbm %s2146_s16, 128  ;;  %s1672_s15 = scalar_lea.hbm %s2294_s5, 256 }
 0x2e1   : > { %p1669_p8 = scmp.ne.s32.totalorder %s2146_s16, %s1668_s11  ;;  %p1673_p12 = scmp.lt.u32.totalorder %s2146_s16, %s2294_s5 }
 0x2e2   : > { %p1674_p13 = scmp.lt.u32.totalorder %s1672_s15, %s1668_s11  ;;  %p1676_p1 = scmp.lt.u32.totalorder %s1668_s11, %s2146_s16 }
 0x2e3   : > { %p1670_p10 = pnand %p1669_p8, %p1909_p3 }
 0x2e4   : > { %p1675_p0 = por %p1674_p13, %p1673_p12 }
 0x2e5   : > { %p1671_p11 = pneg %p1670_p10 }
 0x2e6   : > { %p1677_p2 = por %p1676_p1, %p1675_p0 }
 0x2e8   : > { %p1678_p4 = pnand %p1677_p2, %p1671_p11 }
 0x2ea   : > { %1681 = shalt.err (!%p1678_p4)
}
 0x2eb   : > { %1544 = dma.vmem_to_hbm [thread:$0]  (%p1909_p3), %s2148_s18, 128, %s2146_s16, %s936_s2   ;;  %v923_v31 = vsub.f32 %v921_v15, %v922_v30  ;;  %v903_v32 = vrot.slane %v902_v0, 1 }
 0x2ec   : > { %s989_s9 = sshll.u32 %s346_s29, 4  ;;  %s2191_s23 = scalar_lea.hbm %s2295_s6, %s2137_s17  ;;  %s2202_s9 = int_to_ptr.vmem [resolvable:$true] %s989_s9 }
 0x2ed   : > { %v924_v33 = vmax.f32 %v923_v31, 1e-30  ;;  %v904_v34 = vadd.f32 %v903_v32, %v902_v0  ;;  %s2200_s18 = scalar_lea.hbm %s2296_s7, %s2137_s17  ;;  %s941_s29 = scalar_lea.sflag [#allocation11], %s2156_s19 }
 0x2ee   : > { %s1682_s16 = scalar_lea.vmem %s2194_s20, 128  ;;  %s1816_s2 = smov [#allocation10]  }
 0x2ef   : > { %927 = vst.msk [vmem:[#allocation4] sm:$0xff] %vm395_vm2, %v924_v33  ;;  %930 = vst.msk [vmem:[%s339_s30] sm:$0xff] %vm395_vm2, %v924_v33  ;;  %p1683_p5 = scmp.ne.s32.totalorder %s2194_s20, %s1682_s16  ;;  %s1686_s10 = sshll.u32 %s1816_s2, 4  ;;  %s1687_s10 = int_to_ptr.vmem [resolvable:$false] %s1686_s10 }
 0x2f0   : > { %1542 = vpush %v904_v34  ;;  %s1688_s12 = scalar_lea.vmem %s1687_s10, 256  ;;  %p1689_p8 = scmp.lt.s32.totalorder %s2194_s20, %s1687_s10 }
 0x2f1   : > { %p1684_p6 = pnand %p1683_p5, %p1909_p3  ;;  %p1690_p10 = scmp.lt.s32.totalorder %s1688_s12, %s1682_s16 }
 0x2f3   : > { %p1685_p7 = pneg %p1684_p6  ;;  %p1691_p11 = por %p1690_p10, %p1689_p8 }
 0x2f5   : > { %p1692_p12 = pnand %p1691_p11, %p1685_p7 }
 0x2f7   : > { %1695 = shalt.err (!%p1692_p12)
}
 0x2f8   : > { %s1696_s30 = scalar_lea.hbm %s2191_s23, 128  ;;  %s1700_s22 = scalar_lea.hbm %s2295_s6, 256 }
 0x2f9   : > { %p1697_p13 = scmp.ne.s32.totalorder %s2191_s23, %s1696_s30  ;;  %p1701_p2 = scmp.lt.u32.totalorder %s2191_s23, %s2295_s6 }
 0x2fa   : > { %p1702_p4 = scmp.lt.u32.totalorder %s1700_s22, %s1696_s30  ;;  %p1704_p6 = scmp.lt.u32.totalorder %s1696_s30, %s2191_s23 }
 0x2fb   : > { %p1698_p0 = pnand %p1697_p13, %p1909_p3 }
 0x2fc   : > { %p1703_p5 = por %p1702_p4, %p1701_p2 }
 0x2fd   : > { %p1699_p1 = pneg %p1698_p0 }
 0x2fe   : > { %p1705_p7 = por %p1704_p6, %p1703_p5 }
 0x300   : > { %p1706_p8 = pnand %p1705_p7, %p1699_p1 }
 0x302   : > { %1709 = shalt.err (!%p1706_p8)
}
 0x303   : > { %1545 = dma.vmem_to_hbm [thread:$0]  (%p1909_p3), %s2194_s20, 128, %s2191_s23, %s941_s29  }
 0x304   : > { %s1710_s15 = scalar_lea.vmem %s2202_s9, 128  ;;  %s1817_s16 = smov [#allocation12]  }
 0x305   : > { %p1711_p10 = scmp.ne.s32.totalorder %s2202_s9, %s1710_s15  ;;  %s1714_s2 = sshll.u32 %s1817_s16, 4  ;;  %s1715_s2 = int_to_ptr.vmem [resolvable:$false] %s1714_s2 }
 0x306   : > { %s1716_s10 = scalar_lea.vmem %s1715_s2, 256  ;;  %p1717_p13 = scmp.lt.s32.totalorder %s2202_s9, %s1715_s2 }
 0x307   : > { %p1712_p11 = pnand %p1711_p10, %p1909_p3  ;;  %p1718_p0 = scmp.lt.s32.totalorder %s1716_s10, %s1710_s15 }
 0x309   : > { %p1713_p12 = pneg %p1712_p11  ;;  %p1719_p1 = por %p1718_p0, %p1717_p13 }
 0x30b   : > { %p1720_p2 = pnand %p1719_p1, %p1713_p12 }
 0x30d   : > { %1723 = shalt.err (!%p1720_p2)
}
 0x30e   : > { %s1724_s20 = scalar_lea.hbm %s2200_s18, 128  ;;  %s1728_s30 = scalar_lea.hbm %s2296_s7, 256 }
 0x30f   : > { %p1725_p4 = scmp.ne.s32.totalorder %s2200_s18, %s1724_s20  ;;  %p1729_p7 = scmp.lt.u32.totalorder %s2200_s18, %s2296_s7 }
 0x310   : > { %p1730_p8 = scmp.lt.u32.totalorder %s1728_s30, %s1724_s20  ;;  %p1732_p11 = scmp.lt.u32.totalorder %s1724_s20, %s2200_s18 }
 0x311   : > { %p1726_p5 = pnand %p1725_p4, %p1909_p3 }
 0x312   : > { %p1731_p10 = por %p1730_p8, %p1729_p7 }
 0x313   : > { %p1727_p6 = pneg %p1726_p5 }
 0x314   : > { %p1733_p12 = por %p1732_p11, %p1731_p10 }
 0x316   : > { %p1734_p13 = pnand %p1733_p12, %p1727_p6 }
 0x318   : > { %1737 = shalt.err (!%p1734_p13)
}
 0x319   : > { %1546 = dma.vmem_to_hbm [thread:$0]  (%p1909_p3), %s2202_s9, 128, %s2200_s18, %s941_s29  }
 0x321   : > { %s1543_s22 = spop %1542 }
 0x322   : > { %v906_v35 = vstv %s1543_s22 }
 0x323   : > { %1652 = vrcp.f32 %v906_v35 }
 0x32d   : > { %v1653_v36 = vpop.eup %1652 }
 0x32e   : > { %v908_v37 = vmul.f32 %v1653_v36, %v2124_v58 }
 0x330   : > { %925 = vst.msk [vmem:[#allocation2] sm:$0xff] %vm393_vm5, %v908_v37  ;;  %928 = vst.msk [vmem:[%s1960_s27] sm:$0xff] %vm393_vm5, %v908_v37 }
 0x331 PF: > { %p1560_p0 = scmp.ge.s32.totalorder %s1808_s8, 2  ;;  %s1008_s13 = sand.u32 1, %s1780_s24  }
 0x332   : > { %s1009_s19 = scalar_lea.sflag [#allocation9], %s1008_s13 }
 0x333   : > { %p1551_p1 = pnand %p1560_p0, %p1921_p9 }
 0x335   : > { %1771 = dma.done.wait (!%p1551_p1), %s1009_s19, 128  }
 0x336   : > { %1773 = vsyncadd (!%p1551_p1), %s1009_s19, 4294967168  ;;  %s2316_s9 = sadd.s32 4294967294, %s1808_s8  }
 0x337   : > { %s1017_s18 = sand.u32 1, %s2316_s9  }
 0x338   : > { %s1018_s29 = scalar_lea.sflag [#allocation11], %s1017_s18 }
 0x339   : > { %1775 = dma.done.wait (!%p1551_p1), %s1018_s29, 256  }
 0x33a   : > { %1777 = vsyncadd (!%p1551_p1), %s1018_s29, 4294967040  ;;  %s24_s8 = sadd.s32 1, %s1808_s8   ;;  %s2317_s27 = sld [smem:[#allocation19_spill]] }
 0x33b   : > { %p21_p3 = scmp.ge.s32.totalorder %s24_s8, 8   ;;  %s2318_s11 = sld [smem:[#allocation15_spill]] }
 0x33c   : > { %s2319_s28 = sld [smem:[#allocation16_spill]]  ;;  %s2320_s29 = sld [smem:[#allocation17_spill]] }
 0x33d   : > { %s2321_s30 = sld [smem:[#allocation18_spill]]  ;;  %s2322_s24 = smov %s1784_s25 }
 0x33e   : > { %s2323_s25 = smov %s1788_s26  ;;  %23 = sbr.rel (!%p21_p3) target bundleno = 9 (0x9), region = 130 }
 0x340   : > { %s2324_s26 = smov %s2317_s27 }
 0x341   : > { %s2325_s27 = smov %s2318_s11 }
 0x345   :  { %1032 = vsyncpa [#allocation9], 1 }
 0x346   :  { %1034 = vsyncpa [#allocation9 + $0x1], 1 }
 0x347   :  { %1035 = vsyncpa [#allocation11], 1 }
 0x348   :  { %1037 = vsyncpa [#allocation11 + $0x1], 1 }

</bundles_post_ra>
